<compile_context>
chip_gen: v5e
topology: v5e:2x2
jax: 0.10.0
libtpu: 0.0.40
codegen_flags: <defaults>
</compile_context>

<pallas_src>
import functools
import math

import numpy as np

import jax
import jax.numpy as jnp
from jax.experimental import pallas as pl
from jax.experimental.pallas import tpu as pltpu


# ----------------------------------------------------------------------------
# Host-side helpers
# ----------------------------------------------------------------------------

def _pick_group(H: int, W: int, K: int) -> int:
    """Smallest divisor g of H making the packed output width g*K*K*W a
    multiple of 128 lanes while keeping the interleave matmul <= 256 wide."""
    base_w = K * K * W
    cap = max(256, base_w)
    for g in range(1, H + 1):
        if H % g:
            continue
        if (g * base_w) % 128 == 0 and g * base_w <= cap:
            return g
    return 1  # full-array-width blocks are still legal and DMA-contiguous


def _vmem_budget_bytes() -> int:
    """Per-generation VMEM budget for the double-buffered tiles."""
    try:
        kind = jax.devices()[0].device_kind.lower()
    except Exception:
        return 8 << 20
    if ("v5e" in kind) or ("v5 lite" in kind) or ("v6" in kind) or ("trillium" in kind):
        return 16 << 20   # 128 MiB physical VMEM: bigger tiles amortize per-step cost
    return 8 << 20        # v7x (64 MiB / 2 TCs) and unknown chips: stay conservative


def _pick_rows_per_tile(r_tot: int, rpp: int, bytes_per_row: int,
                        budget: int, fixed_bytes: int) -> int:
    """Row tile: multiple of lcm(8, rpp), within budget, >= 4 grid steps."""
    unit = (rpp * 8) // math.gcd(rpp, 8)
    if unit >= r_tot:
        return r_tot                       # single full-array tile (always legal)
    cap = max(unit, (budget - fixed_bytes) // max(bytes_per_row, 1))
    if r_tot >= 4 * unit:                  # leave >= 4 steps for pipelining / 2 TCs
        cap = min(cap, max(unit, r_tot // 4))
    tr = (cap // unit) * unit
    return int(max(unit, min(tr, r_tot)))


def _perm_matrix(W: int, K: int, g: int) -> np.ndarray:
    """0/1 lane permutation: cat lane (kh*K+kw)*g*W + j*W + w  ->
    output lane (j*K + kh)*K*W + w*K + kw."""
    IW, Wo = g * W, K * W
    OW = K * K * IW
    P = np.zeros((OW, OW), dtype=np.float32)
    for kh in range(K):
        for kw in range(K):
            p = kh * K + kw
            for j in range(g):
                for w in range(W):
                    P[p * IW + j * W + w, (j * K + kh) * Wo + w * K + kw] = 1.0
    return P


def _base_tile(TR: int, W: int, K: int, g: int, rpp: int) -> np.ndarray:
    """Flat output position of (h*K, w*K) for every (row, lane) of one tile.
    Valid for every tile because TR % rpp == 0 (tiles start on plane bounds)."""
    IW, Wo = g * W, K * W
    r = np.arange(TR, dtype=np.int64)
    l = np.arange(IW, dtype=np.int64)
    h = (r % rpp)[:, None] * g + (l // W)[None, :]
    w = (l % W)[None, :]
    return (h * (K * Wo) + w * K).astype(np.int32)


# ----------------------------------------------------------------------------
# Kernels
# ----------------------------------------------------------------------------

def _unpool_kernel(base_ref, perm_ref, val_ref, idx_ref, out_ref, *, K: int, W: int):
    """One row tile: (TR, g*W) values/indices -> (TR, g*K*K*W) output rows."""
    Wo = K * W
    vals = val_ref[...]                         # (TR, IW) value dtype
    d = idx_ref[...] - base_ref[...]            # (TR, IW) int32, add hoisted out of loop
    # K*K VPU compare/selects against immediates (hot path, no matmul here).
    subs = [jnp.where(d == (kh * Wo + kw), vals, 0)
            for kh in range(K) for kw in range(K)]
    cat = jnp.concatenate(subs, axis=1)         # (TR, K*K*IW)
    # Single merged 0/1 permutation matmul on the otherwise-idle MXU does the
    # kw-interleave + (j, kh) placement in one pass (exact in bf16 for bf16 data).
    out = jnp.dot(cat, perm_ref[...], preferred_element_type=jnp.float32)
    out_ref[...] = out.astype(out_ref.dtype)


def _unpool_kernel_k1(base_ref, val_ref, idx_ref, out_ref):
    """K == 1 degenerate case: no interleave, no matmul."""
    hit = idx_ref[...] == base_ref[...]
    out_ref[...] = jnp.where(hit, val_ref[...], 0).astype(out_ref.dtype)


# ----------------------------------------------------------------------------
# Public wrapper
# ----------------------------------------------------------------------------

def max_unpool2d_indexed(values, indices, kernel_size, stride=None, padding=0):
    """values: (N,C,H,W) scattered values (the module's stored `index` tensor).
    indices: (N,C,H,W) flat positions into each (Ho*Wo) output plane (the
    module's forward argument).  Returns (N, C, H*K, W*K) in the value dtype
    (bf16 stays bf16; everything else computes/stores in float32)."""
    K = int(kernel_size)
    stride = K if stride is None else int(stride)
    if stride != K or int(padding) != 0:
        raise NotImplementedError("Only stride == kernel_size and padding == 0 supported.")
    if values.shape != indices.shape:
        raise ValueError("values and indices must have the same (N,C,H,W) shape")

    # bf16 passthrough halves HBM write traffic (the dominant term).
    if values.dtype == jnp.bfloat16:
        vdtype = jnp.bfloat16
    else:
        vdtype = jnp.float32
        values = values.astype(jnp.float32)
    indices = indices.astype(jnp.int32)

    N, C, H, W = map(int, values.shape)
    Ho, Wo = H * K, W * K

    g = _pick_group(H, W, K)       # rows of a plane packed into lanes
    rpp = H // g                   # packed rows per plane
    IW = g * W                     # packed input lane width
    OW = K * K * IW                # packed output lane width (128-multiple when possible)
    R_tot = N * C * rpp            # total packed rows

    # Free (row-major) reshapes of NCHW.
    vals2 = values.reshape(R_tot, IW)
    idx2 = indices.reshape(R_tot, IW)

    # VMEM accounting: double-buffered, lane-padded in/out tiles + f32 intermediates.
    vsize = jnp.dtype(vdtype).itemsize
    pad_iw = ((IW + 127) // 128) * 128
    pad_ow = ((OW + 127) // 128) * 128
    bytes_per_row = (2 * pad_iw * (vsize + 4 + 4)          # values, indices, base tiles
                     + 2 * pad_ow * vsize                  # output tile
                     + (K * K * pad_iw + 2 * pad_ow) * 4)  # subs/cat/matmul intermediates
    fixed_bytes = 2 * OW * OW * vsize + (1 << 20)          # permutation matrix + slack
    budget = _vmem_budget_bytes()
    TR = _pick_rows_per_tile(R_tot, rpp, bytes_per_row, budget, fixed_bytes)
    grid = (pl.cdiv(R_tot, TR),)   # masked partial last tile if TR does not divide R_tot

    base = jnp.asarray(_base_tile(TR, W, K, g, rpp))       # constant tile, fetched once
    vmem_limit = (64 << 20) if budget >= (16 << 20) else (32 << 20)
    cparams = pltpu.CompilerParams(dimension_semantics=("parallel",),
                                   vmem_limit_bytes=vmem_limit)

    if K == 1:
        out2 = pl.pallas_call(
            _unpool_kernel_k1,
            out_shape=jax.ShapeDtypeStruct((R_tot, OW), vdtype),
            grid_spec=pltpu.PrefetchScalarGridSpec(
                num_scalar_prefetch=0,
                grid=grid,
                in_specs=[
                    pl.BlockSpec((TR, IW), lambda i: (0, 0)),   # constant base tile
                    pl.BlockSpec((TR, IW), lambda i: (i, 0)),   # values
                    pl.BlockSpec((TR, IW), lambda i: (i, 0)),   # indices
                ],
                out_specs=pl.BlockSpec((TR, OW), lambda i: (i, 0)),
            ),
            compiler_params=cparams,
        )(base, vals2, idx2)
    else:
        P = jnp.asarray(_perm_matrix(W, K, g)).astype(vdtype)
        kernel = functools.partial(_unpool_kernel, K=K, W=W)
        out2 = pl.pallas_call(
            kernel,
            out_shape=jax.ShapeDtypeStruct((R_tot, OW), vdtype),
            grid_spec=pltpu.PrefetchScalarGridSpec(
                num_scalar_prefetch=0,
                grid=grid,
                in_specs=[
                    pl.BlockSpec((TR, IW), lambda i: (0, 0)),   # constant base tile (one fetch)
                    pl.BlockSpec((OW, OW), lambda i: (0, 0)),   # constant permutation (one fetch)
                    pl.BlockSpec((TR, IW), lambda i: (i, 0)),   # values
                    pl.BlockSpec((TR, IW), lambda i: (i, 0)),   # indices
                ],
                out_specs=pl.BlockSpec((TR, OW), lambda i: (i, 0)),
            ),
            compiler_params=cparams,
        )(base, P, vals2, idx2)

    return out2.reshape(N, C, Ho, Wo)


class MaxUnpool2dIndexed:
    """Mirror of the PyTorch module: stores `index` (the VALUES) and scatters
    them at the flat positions given by the forward argument."""

    def __init__(self, index, kernel_size, stride=None, padding=0):
        self.index = index
        self.kernel_size = kernel_size
        self.stride = kernel_size if stride is None else stride
        self.padding = padding

    def __call__(self, inp):
        return max_unpool2d_indexed(self.index, inp, self.kernel_size,
                                    self.stride, self.padding)


# ----------------------------------------------------------------------------
# Self-test
# ----------------------------------------------------------------------------

def _reference_unpool(values, indices, K):
    """Pure-JAX reference: per-plane scatter into a zero (Ho*Wo) plane."""
    N, C, H, W = values.shape
    Ho, Wo = H * K, W * K
    flat_v = values.reshape(N * C, H * W)
    flat_i = indices.reshape(N * C, H * W)
    out = jnp.zeros((N * C, Ho * Wo), values.dtype)
    out = jax.vmap(lambda o, ii, vv: o.at[ii].set(vv))(out, flat_i, flat_v)
    return out.reshape(N, C, Ho, Wo)


if __name__ == "__main__":
    N, C, H, W, K = 2, 4, 16, 16, 2
    Ho, Wo = H * K, W * K

    key = jax.random.PRNGKey(0)
    k1, k2, k3 = jax.random.split(key, 3)

    # Stored `self.index` tensor acts as the scattered values.
    index_values = jax.random.normal(k1, (N, C, H, W), dtype=jnp.float32)

    # Forward argument: valid in-window flat indices (what MaxPool2d(K) with
    # return_indices=True would produce for some input).
    rh = jax.random.randint(k2, (N, C, H, W), 0, K)
    rw = jax.random.randint(k3, (N, C, H, W), 0, K)
    hh = jnp.arange(H, dtype=jnp.int32).reshape(1, 1, H, 1)
    ww = jnp.arange(W, dtype=jnp.int32).reshape(1, 1, 1, W)
    flat_indices = ((hh * K + rh) * Wo + (ww * K + rw)).astype(jnp.int32)

    # float32 path
    module = MaxUnpool2dIndexed(index_values, kernel_size=K)
    out = jax.block_until_ready(module(flat_indices))
    ref = _reference_unpool(index_values, flat_indices, K)
    assert out.shape == (N, C, Ho, Wo), out.shape
    if not jnp.allclose(out, ref):
        raise AssertionError("Pallas MaxUnpool2d_indexed mismatch vs reference (f32)")

    # bfloat16 path: values pass through the 0/1 interleave matmul exactly and
    # the bf16 output halves HBM write traffic.
    index_bf16 = index_values.astype(jnp.bfloat16)
    out_bf16 = jax.block_until_ready(
        MaxUnpool2dIndexed(index_bf16, kernel_size=K)(flat_indices))
    if out_bf16.dtype != jnp.bfloat16:
        raise AssertionError("expected bf16 output for bf16 values")
    ref_bf16 = _reference_unpool(index_bf16, flat_indices, K)
    if not jnp.allclose(out_bf16.astype(jnp.float32), ref_bf16.astype(jnp.float32)):
        raise AssertionError("Pallas MaxUnpool2d_indexed mismatch vs reference (bf16)")

    print("KERNEL_OK")
</pallas_src>

<mosaic_0001>
module attributes {stable_mosaic.version = 11 : i64} {
  func.func @_unpool_kernel(%arg0: i32, %arg1: memref<16x32xi32, #tpu.memory_space<vmem>>, %arg2: memref<128x128xf32, #tpu.memory_space<vmem>>, %arg3: memref<16x32xf32, #tpu.memory_space<vmem>>, %arg4: memref<16x32xi32, #tpu.memory_space<vmem>>, %arg5: memref<16x128xf32, #tpu.memory_space<vmem>>) attributes {dimension_semantics = [#tpu.dimension_semantics<parallel>], iteration_bounds = array<i64: 4>, scalar_prefetch = 0 : i64, scratch_operands = 0 : i64, tpu.core_type = #tpu.core_type<tc>, window_params = [{pipeline_mode = #tpu.pipeline_mode<synchronous>, transform_indices = @transform_0, window_bounds = array<i64: 16, 32>}, {pipeline_mode = #tpu.pipeline_mode<synchronous>, transform_indices = @transform_1, window_bounds = array<i64: 128, 128>}, {transform_indices = @transform_2, window_bounds = array<i64: 16, 32>}, {transform_indices = @transform_3, window_bounds = array<i64: 16, 32>}, {transform_indices = @transform_4, window_bounds = array<i64: 16, 128>}]} {
    %c0 = arith.constant 0 : index
    %c0_0 = arith.constant 0 : index
    %0 = vector.load %arg3[%c0, %c0_0] : memref<16x32xf32, #tpu.memory_space<vmem>>, vector<16x32xf32>
    %c0_1 = arith.constant 0 : index
    %c0_2 = arith.constant 0 : index
    %1 = vector.load %arg4[%c0_1, %c0_2] : memref<16x32xi32, #tpu.memory_space<vmem>>, vector<16x32xi32>
    %c0_3 = arith.constant 0 : index
    %c0_4 = arith.constant 0 : index
    %2 = vector.load %arg1[%c0_3, %c0_4] : memref<16x32xi32, #tpu.memory_space<vmem>>, vector<16x32xi32>
    %3 = arith.subi %1, %2 : vector<16x32xi32>
    %c0_i32 = arith.constant 0 : i32
    %4 = vector.broadcast %c0_i32 : i32 to vector<16x32xi32>
    %5 = arith.cmpi eq, %3, %4 : vector<16x32xi32>
    %c0_i32_5 = arith.constant 0 : i32
    %6 = arith.sitofp %c0_i32_5 : i32 to f32
    %7 = vector.broadcast %6 : f32 to vector<16x32xf32>
    %8 = arith.select %5, %0, %7 : vector<16x32xi1>, vector<16x32xf32>
    %c1_i32 = arith.constant 1 : i32
    %9 = vector.broadcast %c1_i32 : i32 to vector<16x32xi32>
    %10 = arith.cmpi eq, %3, %9 : vector<16x32xi32>
    %c0_i32_6 = arith.constant 0 : i32
    %11 = arith.sitofp %c0_i32_6 : i32 to f32
    %12 = vector.broadcast %11 : f32 to vector<16x32xf32>
    %13 = arith.select %10, %0, %12 : vector<16x32xi1>, vector<16x32xf32>
    %c32_i32 = arith.constant 32 : i32
    %14 = vector.broadcast %c32_i32 : i32 to vector<16x32xi32>
    %15 = arith.cmpi eq, %3, %14 : vector<16x32xi32>
    %c0_i32_7 = arith.constant 0 : i32
    %16 = arith.sitofp %c0_i32_7 : i32 to f32
    %17 = vector.broadcast %16 : f32 to vector<16x32xf32>
    %18 = arith.select %15, %0, %17 : vector<16x32xi1>, vector<16x32xf32>
    %c33_i32 = arith.constant 33 : i32
    %19 = vector.broadcast %c33_i32 : i32 to vector<16x32xi32>
    %20 = arith.cmpi eq, %3, %19 : vector<16x32xi32>
    %c0_i32_8 = arith.constant 0 : i32
    %21 = arith.sitofp %c0_i32_8 : i32 to f32
    %22 = vector.broadcast %21 : f32 to vector<16x32xf32>
    %23 = arith.select %20, %0, %22 : vector<16x32xi1>, vector<16x32xf32>
    %24 = tpu.concatenate %8, %13, %18, %23 in 1 : vector<16x32xf32>, vector<16x32xf32>, vector<16x32xf32>, vector<16x32xf32> -> vector<16x128xf32>
    %c0_9 = arith.constant 0 : index
    %c0_10 = arith.constant 0 : index
    %25 = vector.load %arg2[%c0_9, %c0_10] : memref<128x128xf32, #tpu.memory_space<vmem>>, vector<128x128xf32>
    %cst = arith.constant dense<0.000000e+00> : vector<16x128xf32>
    %26 = tpu.matmul %24, %25, %cst {dimension_numbers = #tpu.dot_dimension_numbers<[1], [0], [0], [1], [0, 0, 1, 1], [], []>} : vector<16x128xf32>, vector<128x128xf32>, vector<16x128xf32> -> vector<16x128xf32>
    %c0_11 = arith.constant 0 : index
    %c0_12 = arith.constant 0 : index
    %27 = vector.load %arg5[%c0_11, %c0_12] : memref<16x128xf32, #tpu.memory_space<vmem>>, vector<16x128xf32>
    tpu.vector_store %arg5[%c0_11, %c0_12], %26 {strides = array<i32>} : memref<16x128xf32, #tpu.memory_space<vmem>>, vector<16x128xf32>,
    return
  }
  func.func @transform_0(%arg0: i32) -> (i32, i32) {
    %c0_i32 = arith.constant 0 : i32
    %c0_i32_0 = arith.constant 0 : i32
    %c0_i32_1 = arith.constant 0 : i32
    return %c0_i32, %c0_i32_0 : i32, i32
  }
  func.func @transform_1(%arg0: i32) -> (i32, i32) {
    %c0_i32 = arith.constant 0 : i32
    %c0_i32_0 = arith.constant 0 : i32
    %c0_i32_1 = arith.constant 0 : i32
    return %c0_i32, %c0_i32_0 : i32, i32
  }
  func.func @transform_2(%arg0: i32) -> (i32, i32) {
    %c0_i32 = arith.constant 0 : i32
    %c0_i32_0 = arith.constant 0 : i32
    return %arg0, %c0_i32 : i32, i32
  }
  func.func @transform_3(%arg0: i32) -> (i32, i32) {
    %c0_i32 = arith.constant 0 : i32
    %c0_i32_0 = arith.constant 0 : i32
    return %arg0, %c0_i32 : i32, i32
  }
  func.func @transform_4(%arg0: i32) -> (i32, i32) {
    %c0_i32 = arith.constant 0 : i32
    %c0_i32_0 = arith.constant 0 : i32
    return %arg0, %c0_i32 : i32, i32
  }
}

</mosaic_0001>

<bundles_post_ra>
// kernel: tpu_custom_call.1
= control target key start
LH: loop header
LB: loop body
LE: loop exit
PB: predicated region body
PF: predicated region fallthrough
CT: control target
= control target key end

     0   :  { %9 = vsyncpa [#allocation3], 0  ;;  %s758_s0 = inlined_call_operand.vmem [shape: s32[16,32], index: 0, kind: input, shape index: {}]   ;;  %s759_s1 = inlined_call_operand.vmem [shape: f32[128,128], index: 1, kind: input, shape index: {}]   ;;  %s760_s2 = inlined_call_operand.vmem [shape: f32[64,32], index: 2, kind: input, shape index: {}]   ;;  %s761_s3 = inlined_call_operand.vmem [shape: s32[64,32], index: 3, kind: input, shape index: {}]   ;;  %s762_s4 = inlined_call_operand.hbm [shape: f32[64,128], index: 4, kind: output, shape index: {}]  }
   0x1   :  { %11 = vsyncpa [#allocation3 + $0x1], 0  ;;  %s593_s15 = smov 0   ;;  %s595_s16 = smov 0  }
   0x2   :  { %s597_s17 = smov 0   ;;  %s599_s18 = smov 0  }
   0x3 LB: > { %s614_s19 = sadd.s32 4294967295, %s561_s18   ;;  %s409_s20 = sadd.s32 4294967294, %s561_s18   ;;  %s561_s18 = sphi %s599_s18, %s768_s18   ;;  %s557_s17 = sphi %s597_s17, %s767_s17   ;;  %s553_s16 = sphi %s595_s16, %s766_s16   ;;  %s549_s15 = sphi %s593_s15, %s765_s15  }
   0x4   : > { %s618_s21 = sadd.s32 1, %s561_s18   ;;  %s118_s22 = sadd.s32 1, %s557_s17 }
   0x5   : > { %s115_s23 = ssub.s32 %s561_s18, %s618_s21  ;;  %p128_p0 = scmp.ne.s32.totalorder %s557_s17, %s553_s16 }
   0x6   : > { %p116_p1 = scmp.eq.s32.totalorder %s115_s23, 0  ;;  %p129_p2 = scmp.eq.s32.totalorder %s614_s19, 3 }
   0x7   : > { %p134_p3 = scmp.ne.s32.totalorder %s553_s16, %s549_s15  ;;  %p135_p4 = scmp.eq.s32.totalorder %s409_s20, 3 }
   0x8   : > { %s629_s24 = scalar_select %p116_p1, %s557_s17, %s118_s22  }
   0x9   : > { %p631_p5 = por %p129_p2, %p128_p0  ;;  %p635_p6 = por %p135_p4, %p134_p3 }
   0xa   : > { %p412_p7 = scmp.ge.s32.totalorder %s561_s18, 1  ;;  %p177_p8 = scmp.lt.s32.totalorder %s561_s18, 5 }
   0xc   : > { %p178_p9 = pnand %p412_p7, %p177_p8 }
   0xd   : > { %s414_s27 = sshll.u32 (!%p178_p9), %s614_s19, 1  ;;  %s563_s14 = smov (!%p178_p9), 32  }
   0xe   : > { %181 = sbr.rel (%p178_p9) target bundleno = 287 (0x11f), region = 36  ;;  %p209_p10 = scmp.lt.s32.totalorder (!%p178_p9), %s414_s27, 7 }
   0xf   : > { %s423_s22 = sshll.u32 (!%p178_p9), %s614_s19, 4 }
  0x10   : > { %s331_s29 = scalar_lea.hbm (!%p178_p9), %s762_s4, %s423_s22 }
  0x13   : > { %v293_v0 = vld [vmem:[%s759_s1 + $0x78] sm:$0xff]  ;;  %v292_v1 = vld [vmem:[%s759_s1 + $0x70] sm:$0xff]  ;;  %v291_v2 = vld [vmem:[%s759_s1 + $0x68] sm:$0xff]  ;;  %s770_s27 = smov (!%p209_p10, %s414_s27), 7  ;;  %vm269_vm8 = vcmask 261120   ;;  %vm272_vm9 = vcmask 523264  }
  0x14   : > { %294 = vmatpush.msra.mxu0 %v293_v0  ;;  %424 = vmatpush.msra.mxu1 %v293_v0  ;;  %v290_v3 = vld [vmem:[%s759_s1 + $0x60] sm:$0xff]  ;;  %s415_s10 = sshll.u32 %s770_s27, 3  ;;  %v226_v5 = vld [vmem:[%s758_s0 + $0x8] sm:$0xff]  ;;  %v289_v6 = vld [vmem:[%s759_s1 + $0x58] sm:$0xff]  ;;  %vm275_vm10 = vcmask 785408   ;;  %s334_s27 = sshll.u32 %s331_s29, 4  ;;  %s335_s27 = int_to_ptr.hbm [resolvable:$true] %s334_s27 }
  0x15   : > { %v225_v4 = vld [vmem:[%s758_s0] sm:$0xff]  ;;  %s212_s20 = scalar_lea.vmem %s760_s2, %s415_s10  ;;  %s218_s28 = scalar_lea.vmem %s761_s3, %s415_s10  ;;  %v288_v11 = vld [vmem:[%s759_s1 + $0x50] sm:$0xff]  ;;  %v287_v14 = vld [vmem:[%s759_s1 + $0x48] sm:$0xff] }
  0x16   : > { %295 = vmatpush.msra.mxu0 %v292_v1  ;;  %425 = vmatpush.msra.mxu1 %v292_v1  ;;  %v223_v7 = vld [vmem:[%s218_s28] sm:$0xff]  ;;  %v224_v9 = vld [vmem:[%s218_s28 + $0x8] sm:$0xff]  ;;  %v285_v22 = vld [vmem:[%s759_s1 + $0x38] sm:$0xff]  ;;  %s565_s28 = smov 64   ;;  %s513_s7 = sshra.s32 %s335_s27, 4  ;;  %s514_s7 = int_to_ptr.hbm [resolvable:$true] %s513_s7 }
  0x17   : > { %v669_v8 = vld [vmem:[%s212_s20] sm:$0xff]  ;;  %v671_v10 = vsub.s32 %v223_v7, %v225_v4  ;;  %v676_v12 = vld [vmem:[%s212_s20 + $0x8] sm:$0xff]  ;;  %v678_v13 = vsub.s32 %v224_v9, %v226_v5  ;;  %s564_s20 = smov 96   ;;  %v284_v25 = vld [vmem:[%s759_s1 + $0x30] sm:$0xff]  ;;  %s515_s8 = scalar_lea.hbm %s514_s7, 16 }
  0x18   : > { %296 = vmatpush.msra.mxu0 %v291_v2  ;;  %426 = vmatpush.msra.mxu1 %v291_v2  ;;  %v286_v18 = vld [vmem:[%s759_s1 + $0x40] sm:$0xff]  ;;  %v283_v27 = vld [vmem:[%s759_s1 + $0x28] sm:$0xff]  ;;  %v281_v29 = vld [vmem:[%s759_s1 + $0x18] sm:$0xff]  ;;  %p516_p11 = scmp.ne.s32.totalorder %s514_s7, %s515_s8  ;;  %s519_s10 = scalar_lea.hbm %s762_s4, 64 }
  0x19   : > { %vm233_vm0 = vcmp.eq.s32.totalorder %v671_v10, 1  ;;  %vm241_vm1 = vcmp.eq.s32.totalorder %v671_v10, 33  ;;  %vm234_vm2 = vcmp.eq.s32.totalorder %v678_v13, 1  ;;  %vm242_vm3 = vcmp.eq.s32.totalorder %v678_v13, 33  ;;  %v282_v28 = vld [vmem:[%s759_s1 + $0x20] sm:$0xff]  ;;  %v280_v30 = vld [vmem:[%s759_s1 + $0x10] sm:$0xff]  ;;  %p520_p0 = scmp.lt.s32.totalorder %s514_s7, %s762_s4  ;;  %p521_p1 = scmp.lt.s32.totalorder %s519_s10, %s515_s8 }
  0x1a   : > { %297 = vmatpush.msra.mxu0 %v290_v3  ;;  %427 = vmatpush.msra.mxu1 %v290_v3  ;;  %v235_v15 = vsel %vm233_vm0, %v669_v8, 0.0  ;;  %v236_v16 = vsel %vm234_vm2, %v676_v12, 0.0  ;;  %v243_v17 = vsel %vm241_vm1, %v669_v8, 0.0  ;;  %vm237_vm4 = vcmp.eq.s32.totalorder %v671_v10, 32  ;;  %v279_v31 = vld [vmem:[%s759_s1 + $0x8] sm:$0xff]  ;;  %v278_v32 = vld [vmem:[%s759_s1] sm:$0xff]  ;;  %p517_p12 = pnand %p516_p11, %p631_p5 }
  0x1b   : > { %v484_v19 = vpack.i.bf16 %v236_v16, %v235_v15  ;;  %vm238_vm5 = vcmp.eq.s32.totalorder %v678_v13, 32  ;;  %v244_v20 = vsel %vm242_vm3, %v676_v12, 0.0  ;;  %v239_v23 = vsel %vm237_vm4, %v669_v8, 0.0  ;;  %p522_p2 = por %p521_p1, %p520_p0 }
  0x1c   : > { %298 = vmatpush.msra.mxu0 %v289_v6  ;;  %428 = vmatpush.msra.mxu1 %v289_v6  ;;  %v494_v21 = vpack.i.bf16 %v244_v20, %v243_v17  ;;  %v240_v24 = vsel %vm238_vm5, %v676_v12, 0.0  ;;  %vm229_vm6 = vcmp.eq.s32.totalorder %v671_v10, 0  ;;  %vm230_vm7 = vcmp.eq.s32.totalorder %v678_v13, 0  ;;  %p518_p13 = pneg %p517_p12 }
  0x1d   : > { %485 = vrot.lane.b32.xlu0 %v484_v19, %s563_s14  ;;  %v489_v26 = vpack.i.bf16 %v240_v24, %v239_v23  ;;  %v231_v37 = vsel %vm229_vm6, %v669_v8, 0.0  ;;  %v232_v38 = vsel %vm230_vm7, %v676_v12, 0.0  ;;  %s205_s14 = sand.u32 1, %s553_s16  }
  0x1e   : > { %299 = vmatpush.msra.mxu0 %v288_v11  ;;  %429 = vmatpush.msra.mxu1 %v288_v11  ;;  %s320_s6 = scalar_lea.sflag [#allocation3], %s205_s14  ;;  %p523_p3 = pnand %p522_p2, %p518_p13 }
  0x1f   : > { %495 = vrot.lane.b32.xlu1 %v494_v21, %s564_s20  ;;  %s413_s20 = sshll.u32 %s205_s14, 4 }
  0x20   : > { %300 = vmatpush.msra.mxu0 %v287_v14  ;;  %430 = vmatpush.msra.mxu1 %v287_v14  ;;  %s207_s30 = scalar_lea.vmem [#allocation2], %s413_s20 }
  0x21   : > { %s332_s5 = sshll.u32 %s207_s30, 4  ;;  %s333_s5 = int_to_ptr.vmem [resolvable:$true] %s332_s5 }
  0x22   : > { %301 = vmatpush.msra.mxu0 %v286_v18  ;;  %431 = vmatpush.msra.mxu1 %v286_v18 }
  0x24   : > { %302 = vmatpush.msra.mxu0 %v285_v22  ;;  %432 = vmatpush.msra.mxu1 %v285_v22 }
  0x25   : > { %490 = vrot.lane.b32.xlu0 %v489_v26, %s565_s28 }
  0x26   : > { %303 = vmatpush.msra.mxu0 %v284_v25  ;;  %433 = vmatpush.msra.mxu1 %v284_v25 }
  0x28   : > { %304 = vmatpush.msra.mxu0 %v283_v27  ;;  %434 = vmatpush.msra.mxu1 %v283_v27 }
  0x2a   : > { %305 = vmatpush.msra.mxu0 %v282_v28  ;;  %435 = vmatpush.msra.mxu1 %v282_v28 }
  0x2c   : > { %306 = vmatpush.msra.mxu0 %v281_v29  ;;  %436 = vmatpush.msra.mxu1 %v281_v29 }
  0x2e   : > { %307 = vmatpush.msra.mxu0 %v280_v30  ;;  %437 = vmatpush.msra.mxu1 %v280_v30 }
  0x30   : > { %308 = vmatpush.msra.mxu0 %v279_v31  ;;  %438 = vmatpush.msra.mxu1 %v279_v31 }
  0x32   : > { %309 = vmatpush.msra.mxu0 %v278_v32  ;;  %439 = vmatpush.msra.mxu1 %v278_v32 }
  0x8f   : > { %v486_v33 = vpop.permute.xlu0 %485 }
  0x90   : > { %v488_v35 = vunpack.i.h.bf16 %v486_v33  ;;  %v487_v36 = vunpack.i.l.bf16 %v486_v33 }
  0x91   : > { %v496_v34 = vpop.permute.xlu1 %495 }
  0x92   : > { %v498_v40 = vunpack.i.h.bf16 %v496_v34  ;;  %v497_v41 = vunpack.i.l.bf16 %v496_v34  ;;  %v270_v44 = vsel %vm269_vm8, %v231_v37, %v487_v36  ;;  %v271_v45 = vsel %vm269_vm8, %v232_v38, %v488_v35 }
  0x97   : > { %v491_v39 = vpop.permute.xlu0 %490 }
  0x98   : > { %v493_v42 = vunpack.i.h.bf16 %v491_v39  ;;  %v492_v43 = vunpack.i.l.bf16 %v491_v39 }
  0x9a   : > { %v273_v46 = vsel %vm272_vm9, %v270_v44, %v492_v43  ;;  %v274_v47 = vsel %vm272_vm9, %v271_v45, %v493_v42 }
  0x9b   : > { %v276_v48 = vsel %vm275_vm10, %v273_v46, %v497_v41  ;;  %v277_v49 = vsel %vm275_vm10, %v274_v47, %v498_v40 }
  0x9c   : > { %310 = vmatmul.f32.vlgmr.msra.gmra.mxu0 %v276_v48  ;;  %313 = vmatmul.f32.vlgmr.msra.gmra.mxu1 %v277_v49 }
 0x119   : > { %v311_v50 = vpop.f32.mrf.mxu0  ;;  %v314_v51 = vpop.f32.mrf.mxu1 }
 0x11a   : > { %317 = vst [vmem:[%s207_s30] sm:$0xff] %v311_v50 }
 0x11b   : > { %318 = vst [vmem:[%s207_s30 + $0x8] sm:$0xff] %v314_v51 }
 0x11c   : > { %526 = shalt.err (!%p523_p3)
}
 0x11d   : > { %s566_s13 = smov 128   ;;  %s567_s14 = smov 8  }
 0x11e   : > { %440 = dma.vmem_to_hbm [thread:$0]  (%p631_p5), %s333_s5, 256, %s335_s27, %s320_s6, %s566_s13, %s566_s13, %s567_s14  }
 0x11f PF: > { %p446_p4 = scmp.ge.s32.totalorder %s561_s18, 2  ;;  %s349_s20 = sand.u32 1, %s549_s15  }
 0x120   : > { %s350_s22 = scalar_lea.sflag [#allocation3], %s349_s20 }
 0x121   : > { %p443_p7 = pnand %p446_p4, %p635_p6 }
 0x123   : > { %p444_p8 = pneg %p443_p7 }
 0x125   : > { %544 = dma.done.wait (%p444_p8), %s350_s22, 256  }
 0x126   : > { %546 = vsyncadd (%p444_p8), %s350_s22, 4294967040  ;;  %p14_p9 = scmp.ge.s32.totalorder %s618_s21, 6   ;;  %s765_s15 = smov %s553_s16 }
 0x127   : > { %s766_s16 = smov %s557_s17  ;;  %s767_s17 = smov %s629_s24 }
 0x128   : > { %s768_s18 = smov %s618_s21  ;;  %16 = sbr.rel (!%p14_p9) target bundleno = 3 (0x3), region = 74 }
 0x12d   :  { %356 = vsyncpa [#allocation3], 1 }
 0x12e   :  { %358 = vsyncpa [#allocation3 + $0x1], 1 }

</bundles_post_ra>
